<compile_context>
chip_gen: v7x
topology: tpu7x:2x2x1
jax: 0.10.0
libtpu: 0.0.40
codegen_flags: <defaults>
</compile_context>

<pallas_src>
import jax
import jax.numpy as jnp
from jax.experimental import pallas as pl
from jax.experimental.pallas import tpu as pltpu

IN_FEATURES = 360
HIDDEN = 120
OUT_FEATURES = 1


def _round_up(n, m):
    return ((n + m - 1) // m) * m


def _fused_matvec_kernel(x_ref, w_ref, b_ref, o_ref):
    # x_ref: (TB, 360) f32          w_ref: (1, 360) f32  (folded W3 @ W2, row layout)
    # b_ref: (1, 1)    f32 (folded bias)                 o_ref: (TB, 1) f32
    x = x_ref[...]
    w = w_ref[...]                                        # broadcast along sublanes
    # VPU multiply + XLU lane-reduce: avoids an N=1 MXU matmul entirely.
    acc = jnp.sum(x * w, axis=-1, keepdims=True)
    o_ref[...] = (acc + b_ref[...]).astype(o_ref.dtype)


def convnet_forward(x_nchw, w2, b2, w3, b3, *, tb_max=4096):
    """Pallas implementation of ConvNet.forward.

    x_nchw: (B, C, H, W) with C*H*W == 360
    w2: (120, 360) PyTorch layout;  b2: (120,)
    w3: (1, 120)   PyTorch layout;  b3: (1,)
    returns: (B, 1) float32
    """
    B = x_nchw.shape[0]
    x_flat = jnp.asarray(x_nchw, jnp.float32).reshape(B, -1)   # (B, 360), C*H*W order
    assert x_flat.shape[1] == IN_FEATURES

    w2 = jnp.asarray(w2, jnp.float32)          # (120, 360)
    b2 = jnp.asarray(b2, jnp.float32)          # (120,)
    w3 = jnp.asarray(w3, jnp.float32)          # (1, 120)
    b3 = jnp.asarray(b3, jnp.float32)          # (1,)

    # Fold the two linear layers (no nonlinearity between them). Full-precision
    # fold so the kernel path matches the unfused reference math closely.
    hi = jax.lax.Precision.HIGHEST
    w_row = jnp.dot(w3, w2, precision=hi)                      # (1, 360)
    b_comb = (jnp.dot(w3, b2, precision=hi) + b3).reshape(1, 1)  # (1, 1)

    # Batch tiling: large tiles amortize per-grid-step overhead; VMEM at
    # TB=4096 is ~5.6 MiB per block (~11.3 MiB double-buffered), well under the
    # 48 MiB scoped-VMEM limit requested below (safe on v5e/v6e/v7x).
    tb = min(tb_max, _round_up(B, 8))
    b_pad = _round_up(B, tb)
    if b_pad != B:
        # Pad the remainder tile with zero rows; sliced off after the call.
        # (For huge, tile-unaligned batches this is an extra HBM copy; a
        #  masked-edge-block variant would avoid it but is not needed here.)
        x_flat = jnp.pad(x_flat, ((0, b_pad - B), (0, 0)))

    grid = (b_pad // tb,)
    cost = pl.CostEstimate(
        flops=2 * b_pad * IN_FEATURES,
        transcendentals=0,
        bytes_accessed=4 * (b_pad * IN_FEATURES + IN_FEATURES + 1 + b_pad),
    )

    out = pl.pallas_call(
        _fused_matvec_kernel,
        out_shape=jax.ShapeDtypeStruct((b_pad, OUT_FEATURES), jnp.float32),
        grid=grid,
        in_specs=[
            pl.BlockSpec((tb, IN_FEATURES), lambda i: (i, 0)),   # streamed x tiles
            pl.BlockSpec((1, IN_FEATURES), lambda i: (0, 0)),    # resident folded weights
            pl.BlockSpec((1, 1), lambda i: (0, 0)),              # resident folded bias
        ],
        out_specs=pl.BlockSpec((tb, OUT_FEATURES), lambda i: (i, 0)),
        compiler_params=pltpu.CompilerParams(
            dimension_semantics=("parallel",),                   # megacore on v7x
            vmem_limit_bytes=48 * 1024 * 1024,                   # fits big tiles on v5e too
        ),
        cost_estimate=cost,
    )(x_flat, w_row, b_comb)

    return out[:B]


def _init_params(key):
    """Deterministic init matching nn.Linear shapes (uniform +/- 1/sqrt(fan_in))."""
    k1, k2, k3, k4 = jax.random.split(key, 4)
    bound2 = 1.0 / jnp.sqrt(float(IN_FEATURES))
    bound3 = 1.0 / jnp.sqrt(float(HIDDEN))
    w2 = jax.random.uniform(k1, (HIDDEN, IN_FEATURES), jnp.float32, -bound2, bound2)
    b2 = jax.random.uniform(k2, (HIDDEN,), jnp.float32, -bound2, bound2)
    w3 = jax.random.uniform(k3, (OUT_FEATURES, HIDDEN), jnp.float32, -bound3, bound3)
    b3 = jax.random.uniform(k4, (OUT_FEATURES,), jnp.float32, -bound3, bound3)
    return w2, b2, w3, b3


if __name__ == "__main__":
    key = jax.random.PRNGKey(0)
    kx, kp = jax.random.split(key)

    # Small NCHW input whose flattened feature size is 360: (B=2, C=10, H=6, W=6)
    x = jax.random.normal(kx, (2, 10, 6, 6), dtype=jnp.float32)
    w2, b2, w3, b3 = _init_params(kp)

    out = convnet_forward(x, w2, b2, w3, b3)
    out = jax.block_until_ready(out)

    # Pure-JAX reference of the original two-layer math.
    ref = x.reshape(x.shape[0], -1) @ w2.T + b2
    ref = ref @ w3.T + b3
    assert out.shape == (2, 1)
    assert jnp.allclose(out, ref, atol=1e-4, rtol=1e-4)

    print("KERNEL_OK")
</pallas_src>

<mosaic_0001>
module attributes {stable_mosaic.version = 11 : i64} {
  func.func @_fused_matvec_kernel(%arg0: i32, %arg1: memref<8x360xf32, #tpu.memory_space<vmem>>, %arg2: memref<1x360xf32, #tpu.memory_space<vmem>>, %arg3: memref<1x1xf32, #tpu.memory_space<vmem>>, %arg4: memref<8x1xf32, #tpu.memory_space<vmem>>) attributes {dimension_semantics = [#tpu.dimension_semantics<parallel>], iteration_bounds = array<i64: 1>, scalar_prefetch = 0 : i64, scratch_operands = 0 : i64, tpu.core_type = #tpu.core_type<tc>, window_params = [{transform_indices = @transform_0, window_bounds = array<i64: 8, 360>}, {pipeline_mode = #tpu.pipeline_mode<synchronous>, transform_indices = @transform_1, window_bounds = array<i64: 1, 360>}, {pipeline_mode = #tpu.pipeline_mode<synchronous>, transform_indices = @transform_2, window_bounds = array<i64: 1, 1>}, {transform_indices = @transform_3, window_bounds = array<i64: 8, 1>}]} {
    %c0 = arith.constant 0 : index
    %c0_0 = arith.constant 0 : index
    %0 = vector.load %arg1[%c0, %c0_0] : memref<8x360xf32, #tpu.memory_space<vmem>>, vector<8x360xf32>
    %c0_1 = arith.constant 0 : index
    %c0_2 = arith.constant 0 : index
    %1 = vector.load %arg2[%c0_1, %c0_2] : memref<1x360xf32, #tpu.memory_space<vmem>>, vector<1x360xf32>
    %2 = vector.broadcast %1 : vector<1x360xf32> to vector<8x360xf32>
    %3 = arith.mulf %0, %2 : vector<8x360xf32>
    %cst = arith.constant dense<0.000000e+00> : vector<8xf32>
    %4 = vector.multi_reduction <add>, %3, %cst [1] : vector<8x360xf32> to vector<8xf32>
    %5 = vector.shape_cast %4 : vector<8xf32> to vector<8x1xf32>
    %c0_3 = arith.constant 0 : index
    %c0_4 = arith.constant 0 : index
    %6 = vector.load %arg3[%c0_3, %c0_4] : memref<1x1xf32, #tpu.memory_space<vmem>>, vector<1x1xf32>
    %7 = vector.broadcast %6 : vector<1x1xf32> to vector<8x1xf32>
    %8 = arith.addf %5, %7 : vector<8x1xf32>
    %c0_5 = arith.constant 0 : index
    %c0_6 = arith.constant 0 : index
    %9 = vector.load %arg4[%c0_5, %c0_6] : memref<8x1xf32, #tpu.memory_space<vmem>>, vector<8x1xf32>
    tpu.vector_store %arg4[%c0_5, %c0_6], %8 {strides = array<i32>} : memref<8x1xf32, #tpu.memory_space<vmem>>, vector<8x1xf32>,
    return
  }
  func.func @transform_0(%arg0: i32) -> (i32, i32) {
    %c0_i32 = arith.constant 0 : i32
    %c0_i32_0 = arith.constant 0 : i32
    return %arg0, %c0_i32 : i32, i32
  }
  func.func @transform_1(%arg0: i32) -> (i32, i32) {
    %c0_i32 = arith.constant 0 : i32
    %c0_i32_0 = arith.constant 0 : i32
    %c0_i32_1 = arith.constant 0 : i32
    return %c0_i32, %c0_i32_0 : i32, i32
  }
  func.func @transform_2(%arg0: i32) -> (i32, i32) {
    %c0_i32 = arith.constant 0 : i32
    %c0_i32_0 = arith.constant 0 : i32
    %c0_i32_1 = arith.constant 0 : i32
    return %c0_i32, %c0_i32_0 : i32, i32
  }
  func.func @transform_3(%arg0: i32) -> (i32, i32) {
    %c0_i32 = arith.constant 0 : i32
    %c0_i32_0 = arith.constant 0 : i32
    return %arg0, %c0_i32 : i32, i32
  }
}

</mosaic_0001>

<bundles_post_ra>
// kernel: tpu_custom_call.1
= control target key start
LH: loop header
LB: loop body
LE: loop exit
PB: predicated region body
PF: predicated region fallthrough
CT: control target
= control target key end

     0   :  { %s140_s0 = inlined_call_operand.hbm [shape: f32[8,360], index: 0, kind: input, shape index: {}]   ;;  %s141_s1 = inlined_call_operand.vmem [shape: f32[1,360], index: 1, kind: input, shape index: {}]   ;;  %s142_s2 = inlined_call_operand.<no memory space> [shape: f32[1,1], index: 2, kind: input, shape index: {}]   ;;  %s143_s3 = inlined_call_operand.vmem [shape: f32[8,1], index: 3, kind: output, shape index: {}]  }
   0x1   :  { %v8_v0 = vstv %s142_s2 }
   0x2   :  { %9 = vst [vmem:[#allocation2] sm:$0x1] %v8_v0 }
   0x3   :  { %10 = vsyncpa [#allocation4], 0  ;;  %s98_s14 = smov [#allocation3]   ;;  %s74_s18 = scalar_lea.hbm %s140_s0, 384 }
   0x4   :  { %s17_s15 = sshll.u32 %s98_s14, 4  ;;  %p75_p0 = scmp.ne.s32.totalorder %s140_s0, %s74_s18  ;;  %s18_s15 = int_to_ptr.vmem [resolvable:$true] %s17_s15 }
   0x5   :  { %p78_p1 = scmp.lt.u32.totalorder %s74_s18, %s140_s0 }
   0x7   :  { %p80_p2 = pnand %p78_p1, %p75_p0 }
   0x9   :  { %83 = shalt.err (!%p80_p2)
}
   0xa   :  { %s84_s2 = scalar_lea.vmem %s18_s15, 384  ;;  %p89_p4 = scmp.lt.s32.totalorder %s18_s15, %s18_s15 }
   0xb   :  { %p85_p3 = scmp.ne.s32.totalorder %s18_s15, %s84_s2  ;;  %p90_p5 = scmp.lt.s32.totalorder %s84_s2, %s84_s2 }
   0xd   :  { %p91_p6 = por %p90_p5, %p89_p4 }
   0xf   :  { %p92_p7 = pnand %p91_p6, %p85_p3 }
  0x11   :  { %95 = shalt.err (!%p92_p7)
}
  0x12   :  { %20 = dma.hbm_to_vmem [thread:$0]  %s140_s0, 384, %s18_s15, [#allocation4]  }
  0x13   :  { %96 = dma.done.wait [#allocation4], 384  }
  0x14   :  { %97 = vsyncadd [#allocation4], 4294966912  ;;  %v33_v1 = vlaneseq  ;;  %v28_v6 = vld [vmem:[#allocation3] sm:$0xff]  ;;  %v29_v7 = vld [vmem:[#allocation3 + $0x8] sm:$0xff]  ;;  %vm52_vm0 = vcmask 850944   ;;  %vm65_vm1 = vcmask 7168  }
  0x15   :  { %v30_v8 = vld [vmem:[#allocation3 + $0x10] sm:$0xff]  ;;  %v31_v9 = vld [vmem:[%s141_s1] sm:$0x7] }
  0x16   :  { %v34_v2 = vshrl.u32 %v33_v1, 7  ;;  %v72_v19 = vld [vmem:[#allocation2] ss:$0 sm:$0xff] }
  0x18   :  { %v35_v3 = vsub.s32 0, %v34_v2  ;;  %v39_v4 = vsub.s32 1, %v34_v2  ;;  %v43_v5 = vsub.s32 2, %v34_v2 }
  0x1a   :  { %v36_v10 = vrot.slane %v31_v9, %v35_v3  ;;  %v40_v11 = vrot.slane %v31_v9, %v39_v4  ;;  %v44_v12 = vrot.slane %v31_v9, %v43_v5 }
  0x1c   :  { %v48_v13 = vmul.f32 %v36_v10, %v28_v6  ;;  %v49_v14 = vmul.f32 %v40_v11, %v29_v7  ;;  %v50_v15 = vmul.f32 %v44_v12, %v30_v8 }
  0x1e   :  { %v51_v16 = vadd.f32 %v49_v14, %v48_v13  ;;  %v53_v17 = vsel %vm52_vm0, %v50_v15, 0.0 }
  0x20   :  { %v54_v18 = vadd.f32 %v53_v17, %v51_v16 }
  0x22   :  { %55 = vadd.xlane.f32.xlu0 %v54_v18 }
  0xaf   :  { %v56_v20 = vpop.xlane.xlu0 %55 }
  0xb0   :  { %v64_v21 = vadd.f32 %v72_v19, %v56_v20 }
  0xb2   :  { %66 = vst.msk [vmem:[%s143_s3] sm:$0xff] %vm65_vm1, %v64_v21 }
  0xb3   :  { %71 = vsyncpa [#allocation4], 1 }

</bundles_post_ra>
